<compile_context>
chip_gen: v6e
topology: v6e:2x2x1
jax: 0.10.0
libtpu: 0.0.40
codegen_flags: <defaults>
</compile_context>

<pallas_src>
import jax
import jax.numpy as jnp
from jax.experimental import pallas as pl
from jax.experimental.pallas import tpu as pltpu


def _round_up(x, m):
    return (x + m - 1) // m * m


def ffn_kernel(x_ref, w1_ref, b1_ref, w2_ref, b2_ref, o_ref):
    # hidden = relu(x @ W1 + b1); accumulate in f32 on the MXU.
    x = x_ref[...].astype(w1_ref.dtype)
    h = jnp.dot(x, w1_ref[...], preferred_element_type=jnp.float32)
    h = jnp.maximum(h + b1_ref[...].astype(jnp.float32), 0.0)
    # out = hidden @ W2 + b2.  Downcast the f32 accumulator to the weight dtype
    # so a bf16 W2 runs a bf16 GEMM on the MXU (no-op for f32 weights).
    o = jnp.dot(h.astype(w2_ref.dtype), w2_ref[...],
                preferred_element_type=jnp.float32)
    o = o + b2_ref[...].astype(jnp.float32)
    # TODO(synk): training-mode dropout not applied (inference semantics: identity).
    o_ref[...] = o.astype(o_ref.dtype)


def _vmem_bytes(tm, D, H, x_itemsize, w_itemsize):
    """Estimated VMEM footprint for one grid step at row tile tm."""
    weight_bytes = (D * H + H * D + H + D) * w_itemsize      # single-buffered
    io_bytes = 2 * 2 * tm * D * x_itemsize                    # x + out, 2-deep
    # f32 hidden + f32 out accumulator + cast copies (x -> w dtype, h -> w dtype)
    act_bytes = tm * (H * 4 + D * 4 + D * w_itemsize + H * w_itemsize)
    return weight_bytes + io_bytes + act_bytes


def feed_forward(x, w1, b1, w2, b2, *, max_tm=512, vmem_budget=48 << 20):
    """FFN forward pass.

    x  : (batch, seq, d_model)
    w1 : (d_model, hidden)   b1 : (hidden,)
    w2 : (hidden, d_model)   b2 : (d_model,)

    Weights may be passed in bf16 (recommended on v6e/v7x); accumulation is f32.
    """
    B, S, D = x.shape
    H = w1.shape[1]
    M = B * S

    x_itemsize = jnp.dtype(x.dtype).itemsize
    w_itemsize = jnp.dtype(w1.dtype).itemsize

    # Pick the largest row tile (multiple of 8, <= max_tm) that fits the VMEM
    # budget, and don't pad a tiny M up to a huge tile.
    tm = 8
    cand = max_tm
    while cand >= 8:
        if _vmem_bytes(cand, D, H, x_itemsize, w_itemsize) <= vmem_budget:
            tm = cand
            break
        cand //= 2
    tm = max(8, min(tm, _round_up(M, 8)))
    M_pad = _round_up(M, tm)

    x2d = x.reshape(M, D)
    if M_pad != M:
        # Remainder rows: pad, compute, slice off below.
        x2d = jnp.pad(x2d, ((0, M_pad - M), (0, 0)))

    b1_2d = b1.reshape(1, H)
    b2_2d = b2.reshape(1, D)

    grid = (M_pad // tm,)

    needed = _vmem_bytes(tm, D, H, x_itemsize, w_itemsize)
    vmem_limit = int(min(max(32 << 20, int(1.25 * needed)), 128 << 20))

    out2d = pl.pallas_call(
        ffn_kernel,
        out_shape=jax.ShapeDtypeStruct((M_pad, D), x.dtype),
        grid_spec=pltpu.PrefetchScalarGridSpec(
            num_scalar_prefetch=0,
            grid=grid,
            in_specs=[
                # Activation row tile: default 2-deep pipelining.
                pl.BlockSpec((tm, D), lambda i: (i, 0)),
                # Resident operands (constant index_map): single-buffer them to
                # halve their VMEM footprint; they are fetched once.
                pl.BlockSpec((D, H), lambda i: (0, 0),
                             pipeline_mode=pl.Buffered(1)),
                pl.BlockSpec((1, H), lambda i: (0, 0),
                             pipeline_mode=pl.Buffered(1)),
                pl.BlockSpec((H, D), lambda i: (0, 0),
                             pipeline_mode=pl.Buffered(1)),
                pl.BlockSpec((1, D), lambda i: (0, 0),
                             pipeline_mode=pl.Buffered(1)),
            ],
            out_specs=pl.BlockSpec((tm, D), lambda i: (i, 0)),
        ),
        compiler_params=pltpu.CompilerParams(
            dimension_semantics=("parallel",),
            vmem_limit_bytes=vmem_limit,
        ),
    )(x2d, w1, b1_2d, w2, b2_2d)

    return out2d[:M].reshape(B, S, D)


def ffn_reference(x, w1, b1, w2, b2):
    h = jnp.maximum(jnp.dot(x, w1) + b1, 0.0)
    return jnp.dot(h, w2) + b2


if __name__ == "__main__":
    # d_model=128 keeps the output lane-dense; seq=9 makes M=18 so the
    # remainder/padding path is exercised.
    batch, seq, d_model = 2, 9, 128
    hidden = d_model * 4  # 512

    key = jax.random.PRNGKey(0)
    kx, k1, k2, k3, k4 = jax.random.split(key, 5)

    x = jax.random.normal(kx, (batch, seq, d_model), dtype=jnp.float32)
    # nn.Linear stores (out, in); we keep (in, out) for x @ W.
    w1 = jax.random.normal(k1, (d_model, hidden), dtype=jnp.float32) * 0.05
    b1 = jax.random.normal(k2, (hidden,), dtype=jnp.float32) * 0.05
    w2 = jax.random.normal(k3, (hidden, d_model), dtype=jnp.float32) * 0.05
    b2 = jax.random.normal(k4, (d_model,), dtype=jnp.float32) * 0.05

    out = jax.block_until_ready(feed_forward(x, w1, b1, w2, b2))
    ref = ffn_reference(x, w1, b1, w2, b2)

    assert out.shape == (batch, seq, d_model)
    assert jnp.allclose(out, ref, atol=1e-4, rtol=1e-4)

    print("KERNEL_OK")
</pallas_src>

<mosaic_0001>
module attributes {stable_mosaic.version = 11 : i64} {
  func.func @ffn_kernel(%arg0: i32, %arg1: memref<24x128xf32, #tpu.memory_space<vmem>>, %arg2: memref<128x512xf32, #tpu.memory_space<vmem>>, %arg3: memref<1x512xf32, #tpu.memory_space<vmem>>, %arg4: memref<512x128xf32, #tpu.memory_space<vmem>>, %arg5: memref<1x128xf32, #tpu.memory_space<vmem>>, %arg6: memref<24x128xf32, #tpu.memory_space<vmem>>) attributes {dimension_semantics = [#tpu.dimension_semantics<parallel>], iteration_bounds = array<i64: 1>, scalar_prefetch = 0 : i64, scratch_operands = 0 : i64, tpu.core_type = #tpu.core_type<tc>, window_params = [{transform_indices = @transform_0, window_bounds = array<i64: 24, 128>}, {pipeline_mode = #tpu.pipeline_mode<synchronous>, transform_indices = @transform_1, window_bounds = array<i64: 128, 512>}, {pipeline_mode = #tpu.pipeline_mode<synchronous>, transform_indices = @transform_2, window_bounds = array<i64: 1, 512>}, {pipeline_mode = #tpu.pipeline_mode<synchronous>, transform_indices = @transform_3, window_bounds = array<i64: 512, 128>}, {pipeline_mode = #tpu.pipeline_mode<synchronous>, transform_indices = @transform_4, window_bounds = array<i64: 1, 128>}, {transform_indices = @transform_5, window_bounds = array<i64: 24, 128>}]} {
    %c0 = arith.constant 0 : index
    %c0_0 = arith.constant 0 : index
    %0 = vector.load %arg1[%c0, %c0_0] : memref<24x128xf32, #tpu.memory_space<vmem>>, vector<24x128xf32>
    %c0_1 = arith.constant 0 : index
    %c0_2 = arith.constant 0 : index
    %1 = vector.load %arg2[%c0_1, %c0_2] : memref<128x512xf32, #tpu.memory_space<vmem>>, vector<128x512xf32>
    %cst = arith.constant dense<0.000000e+00> : vector<24x512xf32>
    %2 = tpu.matmul %0, %1, %cst {dimension_numbers = #tpu.dot_dimension_numbers<[1], [0], [0], [1], [0, 0, 1, 1], [], []>} : vector<24x128xf32>, vector<128x512xf32>, vector<24x512xf32> -> vector<24x512xf32>
    %c0_3 = arith.constant 0 : index
    %c0_4 = arith.constant 0 : index
    %3 = vector.load %arg3[%c0_3, %c0_4] : memref<1x512xf32, #tpu.memory_space<vmem>>, vector<1x512xf32>
    %4 = vector.broadcast %3 : vector<1x512xf32> to vector<24x512xf32>
    %5 = arith.addf %2, %4 : vector<24x512xf32>
    %cst_5 = arith.constant 0.000000e+00 : f32
    %6 = vector.broadcast %cst_5 : f32 to vector<24x512xf32>
    %7 = arith.maximumf %5, %6 : vector<24x512xf32>
    %c0_6 = arith.constant 0 : index
    %c0_7 = arith.constant 0 : index
    %8 = vector.load %arg4[%c0_6, %c0_7] : memref<512x128xf32, #tpu.memory_space<vmem>>, vector<512x128xf32>
    %cst_8 = arith.constant dense<0.000000e+00> : vector<24x128xf32>
    %9 = tpu.matmul %7, %8, %cst_8 {dimension_numbers = #tpu.dot_dimension_numbers<[1], [0], [0], [1], [0, 0, 1, 1], [], []>} : vector<24x512xf32>, vector<512x128xf32>, vector<24x128xf32> -> vector<24x128xf32>
    %c0_9 = arith.constant 0 : index
    %c0_10 = arith.constant 0 : index
    %10 = vector.load %arg5[%c0_9, %c0_10] : memref<1x128xf32, #tpu.memory_space<vmem>>, vector<1x128xf32>
    %11 = vector.broadcast %10 : vector<1x128xf32> to vector<24x128xf32>
    %12 = arith.addf %9, %11 : vector<24x128xf32>
    %c0_11 = arith.constant 0 : index
    %c0_12 = arith.constant 0 : index
    %13 = vector.load %arg6[%c0_11, %c0_12] : memref<24x128xf32, #tpu.memory_space<vmem>>, vector<24x128xf32>
    tpu.vector_store %arg6[%c0_11, %c0_12], %12 {strides = array<i32>} : memref<24x128xf32, #tpu.memory_space<vmem>>, vector<24x128xf32>,
    return
  }
  func.func @transform_0(%arg0: i32) -> (i32, i32) {
    %c0_i32 = arith.constant 0 : i32
    %c0_i32_0 = arith.constant 0 : i32
    return %arg0, %c0_i32 : i32, i32
  }
  func.func @transform_1(%arg0: i32) -> (i32, i32) {
    %c0_i32 = arith.constant 0 : i32
    %c0_i32_0 = arith.constant 0 : i32
    %c0_i32_1 = arith.constant 0 : i32
    return %c0_i32, %c0_i32_0 : i32, i32
  }
  func.func @transform_2(%arg0: i32) -> (i32, i32) {
    %c0_i32 = arith.constant 0 : i32
    %c0_i32_0 = arith.constant 0 : i32
    %c0_i32_1 = arith.constant 0 : i32
    return %c0_i32, %c0_i32_0 : i32, i32
  }
  func.func @transform_3(%arg0: i32) -> (i32, i32) {
    %c0_i32 = arith.constant 0 : i32
    %c0_i32_0 = arith.constant 0 : i32
    %c0_i32_1 = arith.constant 0 : i32
    return %c0_i32, %c0_i32_0 : i32, i32
  }
  func.func @transform_4(%arg0: i32) -> (i32, i32) {
    %c0_i32 = arith.constant 0 : i32
    %c0_i32_0 = arith.constant 0 : i32
    %c0_i32_1 = arith.constant 0 : i32
    return %c0_i32, %c0_i32_0 : i32, i32
  }
  func.func @transform_5(%arg0: i32) -> (i32, i32) {
    %c0_i32 = arith.constant 0 : i32
    %c0_i32_0 = arith.constant 0 : i32
    return %arg0, %c0_i32 : i32, i32
  }
}

</mosaic_0001>

<bundles_post_ra>
// kernel: tpu_custom_call.1
= control target key start
LH: loop header
LB: loop body
LE: loop exit
PB: predicated region body
PF: predicated region fallthrough
CT: control target
= control target key end

     0   :  { %10 = vsyncpa [#allocation3], 0  ;;  %s868_s0 = inlined_call_operand.hbm [shape: f32[24,128], index: 0, kind: input, shape index: {}]   ;;  %s869_s1 = inlined_call_operand.hbm [shape: f32[128,512], index: 1, kind: input, shape index: {}]   ;;  %s870_s2 = inlined_call_operand.hbm [shape: f32[1,512], index: 2, kind: input, shape index: {}]   ;;  %s871_s3 = inlined_call_operand.hbm [shape: f32[512,128], index: 3, kind: input, shape index: {}]   ;;  %s872_s4 = inlined_call_operand.vmem [shape: f32[1,128], index: 4, kind: input, shape index: {}]   ;;  %s873_s5 = inlined_call_operand.hbm [shape: f32[24,128], index: 5, kind: output, shape index: {}]  }
   0x1   :  { %11 = vsyncpa [#allocation6], 0 }
   0x2   :  { %12 = vsyncpa [#allocation9], 0 }
   0x3   :  { %13 = vsyncpa [#allocation4], 0  ;;  %s795_s18 = smov [#allocation5]  }
   0x4   :  { %s31_s19 = sshll.u32 %s795_s18, 4  ;;  %s32_s19 = int_to_ptr.vmem [resolvable:$true] %s31_s19 }
   0x5   :  { %s695_s20 = scalar_lea.vmem %s32_s19, 8192  ;;  %p700_p1 = scmp.lt.s32.totalorder %s32_s19, %s32_s19 }
   0x6   :  { %p696_p0 = scmp.ne.s32.totalorder %s32_s19, %s695_s20  ;;  %p701_p2 = scmp.lt.s32.totalorder %s695_s20, %s695_s20 }
   0x8   :  { %p702_p3 = por %p701_p2, %p700_p1 }
   0xa   :  { %p703_p4 = pnand %p702_p3, %p696_p0 }
   0xc   :  { %706 = shalt.err (!%p703_p4)
}
   0xd   :  { %s796_s21 = smov 512   ;;  %s797_s22 = smov 32  }
   0xe   :  { %37 = dma.hbm_to_vmem [thread:$0]  %s869_s1, 8192, %s32_s19, [#allocation6], %s796_s21, %s796_s21, %s797_s22  }
   0xf   :  { %s798_s25 = smov [#allocation2]  }
  0x10   :  { %s19_s26 = sshll.u32 %s798_s25, 4  ;;  %s20_s26 = int_to_ptr.vmem [resolvable:$true] %s19_s26 }
  0x11   :  { %s715_s27 = scalar_lea.vmem %s20_s26, 384  ;;  %p720_p6 = scmp.lt.s32.totalorder %s20_s26, %s20_s26 }
  0x12   :  { %p716_p5 = scmp.ne.s32.totalorder %s20_s26, %s715_s27  ;;  %p721_p7 = scmp.lt.s32.totalorder %s715_s27, %s715_s27 }
  0x14   :  { %p722_p8 = por %p721_p7, %p720_p6 }
  0x16   :  { %p723_p9 = pnand %p722_p8, %p716_p5 }
  0x18   :  { %726 = shalt.err (!%p723_p9)
}
  0x19   :  { %s799_s28 = smov 128   ;;  %s800_s29 = smov 8  }
  0x1a   :  { %25 = dma.hbm_to_vmem [thread:$0]  %s868_s0, 384, %s20_s26, [#allocation3], %s799_s28, %s799_s28, %s800_s29  }
  0x1b   :  { %s801_s1 = smov [#allocation7]   ;;  %s802_s8 = smov [#allocation8]  }
  0x1c   :  { %s44_s7 = sshll.u32 %s801_s1, 4  ;;  %s53_s9 = sshll.u32 %s802_s8, 4  ;;  %s45_s7 = int_to_ptr.vmem [resolvable:$true] %s44_s7  ;;  %s54_s9 = int_to_ptr.vmem [resolvable:$true] %s53_s9 }
  0x1d   :  { %s735_s10 = scalar_lea.vmem %s45_s7, 64  ;;  %p740_p11 = scmp.lt.s32.totalorder %s45_s7, %s45_s7 }
  0x1e   :  { %p736_p10 = scmp.ne.s32.totalorder %s45_s7, %s735_s10  ;;  %p741_p12 = scmp.lt.s32.totalorder %s735_s10, %s735_s10 }
  0x20   :  { %p742_p13 = por %p741_p12, %p740_p11 }
  0x22   :  { %p743_p0 = pnand %p742_p13, %p736_p10 }
  0x24   :  { %746 = shalt.err (!%p743_p0)
}
  0x25   :  { %47 = dma.hbm_to_vmem [thread:$0]  %s870_s2, 64, %s45_s7, [#allocation6]  }
  0x26   :  { %s755_s13 = scalar_lea.vmem %s54_s9, 8192  ;;  %p760_p2 = scmp.lt.s32.totalorder %s54_s9, %s54_s9 }
  0x27   :  { %p756_p1 = scmp.ne.s32.totalorder %s54_s9, %s755_s13  ;;  %p761_p3 = scmp.lt.s32.totalorder %s755_s13, %s755_s13 }
  0x29   :  { %p762_p4 = por %p761_p3, %p760_p2 }
  0x2b   :  { %p763_p5 = pnand %p762_p4, %p756_p1 }
  0x2d   :  { %766 = shalt.err (!%p763_p5)
}
  0x2e   :  { %59 = dma.hbm_to_vmem [thread:$0]  %s871_s3, 8192, %s54_s9, [#allocation9], %s799_s28, %s799_s28, %s800_s29  }
  0x2f   :  { %787 = dma.done.wait [#allocation3], 384  }
  0x30   :  { %788 = vsyncadd [#allocation3], 4294966912 }
  0x31   :  { %789 = dma.done.wait [#allocation6], 8256  }
  0x32   :  { %790 = vsyncadd [#allocation6], 4294959040 }
  0x33   :  { %791 = dma.done.wait [#allocation9], 8192  }
  0x34   :  { %792 = vsyncadd [#allocation9], 4294959104  ;;  %v803_v0 = vmov 0.0   ;;  %v138_v1 = vld [vmem:[#allocation5 + $0x1e8] sm:$0xff]  ;;  %v140_v2 = vld [vmem:[#allocation5 + $0x1f8] sm:$0xff] }
  0x35   :  { %227 = vmatprep.mubr.f32.mxu0 %v803_v0  ;;  %310 = vmatprep.mubr.f32.mxu1 %v803_v0  ;;  %v137_v3 = vld [vmem:[#allocation5 + $0x1e0] sm:$0xff]  ;;  %v139_v4 = vld [vmem:[#allocation5 + $0x1f0] sm:$0xff]  ;;  %v134_v5 = vld [vmem:[#allocation5 + $0x1c8] sm:$0xff] }
  0x36   :  { %163 = vmatprep.subr.mxu0 %v138_v1  ;;  %246 = vmatprep.subr.mxu1 %v140_v2  ;;  %v136_v6 = vld [vmem:[#allocation5 + $0x1d8] sm:$0xff]  ;;  %v133_v7 = vld [vmem:[#allocation5 + $0x1c0] sm:$0xff]  ;;  %v135_v8 = vld [vmem:[#allocation5 + $0x1d0] sm:$0xff] }
  0x37   :  { %164 = vmatpush1.msra.mxu0 %v137_v3  ;;  %247 = vmatpush1.msra.mxu1 %v139_v4  ;;  %v130_v9 = vld [vmem:[#allocation5 + $0x1a8] sm:$0xff]  ;;  %v132_v10 = vld [vmem:[#allocation5 + $0x1b8] sm:$0xff]  ;;  %v129_v11 = vld [vmem:[#allocation5 + $0x1a0] sm:$0xff] }
  0x38   :  { %165 = vmatprep.subr.mxu0 %v134_v5  ;;  %248 = vmatprep.subr.mxu1 %v136_v6  ;;  %v131_v12 = vld [vmem:[#allocation5 + $0x1b0] sm:$0xff]  ;;  %v126_v13 = vld [vmem:[#allocation5 + $0x188] sm:$0xff]  ;;  %v128_v14 = vld [vmem:[#allocation5 + $0x198] sm:$0xff] }
  0x39   :  { %166 = vmatpush1.msra.mxu0 %v133_v7  ;;  %249 = vmatpush1.msra.mxu1 %v135_v8  ;;  %v125_v15 = vld [vmem:[#allocation5 + $0x180] sm:$0xff]  ;;  %v127_v16 = vld [vmem:[#allocation5 + $0x190] sm:$0xff]  ;;  %v122_v17 = vld [vmem:[#allocation5 + $0x168] sm:$0xff] }
  0x3a   :  { %167 = vmatprep.subr.mxu0 %v130_v9  ;;  %250 = vmatprep.subr.mxu1 %v132_v10  ;;  %v124_v18 = vld [vmem:[#allocation5 + $0x178] sm:$0xff]  ;;  %v121_v19 = vld [vmem:[#allocation5 + $0x160] sm:$0xff]  ;;  %v123_v20 = vld [vmem:[#allocation5 + $0x170] sm:$0xff] }
  0x3b   :  { %168 = vmatpush1.msra.mxu0 %v129_v11  ;;  %251 = vmatpush1.msra.mxu1 %v131_v12  ;;  %v118_v21 = vld [vmem:[#allocation5 + $0x148] sm:$0xff]  ;;  %v120_v22 = vld [vmem:[#allocation5 + $0x158] sm:$0xff]  ;;  %v117_v23 = vld [vmem:[#allocation5 + $0x140] sm:$0xff] }
  0x3c   :  { %169 = vmatprep.subr.mxu0 %v126_v13  ;;  %252 = vmatprep.subr.mxu1 %v128_v14  ;;  %v119_v24 = vld [vmem:[#allocation5 + $0x150] sm:$0xff]  ;;  %v114_v25 = vld [vmem:[#allocation5 + $0x128] sm:$0xff]  ;;  %v116_v26 = vld [vmem:[#allocation5 + $0x138] sm:$0xff] }
  0x3d   :  { %170 = vmatpush1.msra.mxu0 %v125_v15  ;;  %253 = vmatpush1.msra.mxu1 %v127_v16  ;;  %v113_v27 = vld [vmem:[#allocation5 + $0x120] sm:$0xff]  ;;  %v115_v28 = vld [vmem:[#allocation5 + $0x130] sm:$0xff]  ;;  %v110_v29 = vld [vmem:[#allocation5 + $0x108] sm:$0xff] }
  0x3e   :  { %171 = vmatprep.subr.mxu0 %v122_v17  ;;  %254 = vmatprep.subr.mxu1 %v124_v18  ;;  %v112_v30 = vld [vmem:[#allocation5 + $0x118] sm:$0xff]  ;;  %v109_v31 = vld [vmem:[#allocation5 + $0x100] sm:$0xff]  ;;  %v111_v32 = vld [vmem:[#allocation5 + $0x110] sm:$0xff] }
  0x3f   :  { %172 = vmatpush1.msra.mxu0 %v121_v19  ;;  %255 = vmatpush1.msra.mxu1 %v123_v20  ;;  %v106_v33 = vld [vmem:[#allocation5 + $0xe8] sm:$0xff]  ;;  %v108_v34 = vld [vmem:[#allocation5 + $0xf8] sm:$0xff]  ;;  %v105_v35 = vld [vmem:[#allocation5 + $0xe0] sm:$0xff] }
  0x40   :  { %173 = vmatprep.subr.mxu0 %v118_v21  ;;  %256 = vmatprep.subr.mxu1 %v120_v22  ;;  %v107_v36 = vld [vmem:[#allocation5 + $0xf0] sm:$0xff]  ;;  %v102_v37 = vld [vmem:[#allocation5 + $0xc8] sm:$0xff]  ;;  %v104_v38 = vld [vmem:[#allocation5 + $0xd8] sm:$0xff] }
  0x41   :  { %174 = vmatpush1.msra.mxu0 %v117_v23  ;;  %257 = vmatpush1.msra.mxu1 %v119_v24  ;;  %v101_v39 = vld [vmem:[#allocation5 + $0xc0] sm:$0xff]  ;;  %v103_v40 = vld [vmem:[#allocation5 + $0xd0] sm:$0xff]  ;;  %v98_v41 = vld [vmem:[#allocation5 + $0xa8] sm:$0xff] }
  0x42   :  { %175 = vmatprep.subr.mxu0 %v114_v25  ;;  %258 = vmatprep.subr.mxu1 %v116_v26  ;;  %v100_v42 = vld [vmem:[#allocation5 + $0xb8] sm:$0xff]  ;;  %v97_v43 = vld [vmem:[#allocation5 + $0xa0] sm:$0xff]  ;;  %v99_v44 = vld [vmem:[#allocation5 + $0xb0] sm:$0xff] }
  0x43   :  { %176 = vmatpush1.msra.mxu0 %v113_v27  ;;  %259 = vmatpush1.msra.mxu1 %v115_v28  ;;  %v94_v45 = vld [vmem:[#allocation5 + $0x88] sm:$0xff]  ;;  %v96_v46 = vld [vmem:[#allocation5 + $0x98] sm:$0xff]  ;;  %v93_v47 = vld [vmem:[#allocation5 + $0x80] sm:$0xff] }
  0x44   :  { %177 = vmatprep.subr.mxu0 %v110_v29  ;;  %260 = vmatprep.subr.mxu1 %v112_v30  ;;  %v95_v48 = vld [vmem:[#allocation5 + $0x90] sm:$0xff]  ;;  %v90_v49 = vld [vmem:[#allocation5 + $0x68] sm:$0xff]  ;;  %v92_v50 = vld [vmem:[#allocation5 + $0x78] sm:$0xff] }
  0x45   :  { %178 = vmatpush1.msra.mxu0 %v109_v31  ;;  %261 = vmatpush1.msra.mxu1 %v111_v32  ;;  %v89_v51 = vld [vmem:[#allocation5 + $0x60] sm:$0xff]  ;;  %v91_v52 = vld [vmem:[#allocation5 + $0x70] sm:$0xff]  ;;  %v86_v53 = vld [vmem:[#allocation5 + $0x48] sm:$0xff] }
  0x46   :  { %179 = vmatprep.subr.mxu0 %v106_v33  ;;  %262 = vmatprep.subr.mxu1 %v108_v34  ;;  %v88_v54 = vld [vmem:[#allocation5 + $0x58] sm:$0xff]  ;;  %v85_v55 = vld [vmem:[#allocation5 + $0x40] sm:$0xff]  ;;  %v87_v56 = vld [vmem:[#allocation5 + $0x50] sm:$0xff] }
  0x47   :  { %180 = vmatpush1.msra.mxu0 %v105_v35  ;;  %263 = vmatpush1.msra.mxu1 %v107_v36  ;;  %v82_v57 = vld [vmem:[#allocation5 + $0x28] sm:$0xff]  ;;  %v84_v58 = vld [vmem:[#allocation5 + $0x38] sm:$0xff]  ;;  %v81_v59 = vld [vmem:[#allocation5 + $0x20] sm:$0xff] }
  0x48   :  { %181 = vmatprep.subr.mxu0 %v102_v37  ;;  %264 = vmatprep.subr.mxu1 %v104_v38  ;;  %v83_v60 = vld [vmem:[#allocation5 + $0x30] sm:$0xff]  ;;  %v78_v61 = vld [vmem:[#allocation5 + $0x8] sm:$0xff]  ;;  %v80_v62 = vld [vmem:[#allocation5 + $0x18] sm:$0xff] }
  0x49   :  { %182 = vmatpush1.msra.mxu0 %v101_v39  ;;  %265 = vmatpush1.msra.mxu1 %v103_v40  ;;  %v77_v63 = vld [vmem:[#allocation5] sm:$0xff]  ;;  %v79_v1 = vld [vmem:[#allocation5 + $0x10] sm:$0xff]  ;;  %v74_v2 = vld [vmem:[#allocation2] sm:$0xff] }
  0x4a   :  { %183 = vmatprep.subr.mxu0 %v98_v41  ;;  %266 = vmatprep.subr.mxu1 %v100_v42  ;;  %v372_v3 = vld [vmem:[#allocation8 + $0xf8] sm:$0xff]  ;;  %v75_v7 = vld [vmem:[#allocation2 + $0x8] sm:$0xff]  ;;  %v369_v17 = vld [vmem:[#allocation8 + $0xe0] sm:$0xff] }
  0x4b   :  { %184 = vmatpush1.msra.mxu0 %v97_v43  ;;  %267 = vmatpush1.msra.mxu1 %v99_v44  ;;  %v404_v4 = vld [vmem:[#allocation8 + $0x1f8] sm:$0xff]  ;;  %v371_v8 = vld [vmem:[#allocation8 + $0xf0] sm:$0xff]  ;;  %v370_v13 = vld [vmem:[#allocation8 + $0xe8] sm:$0xff] }
  0x4c   :  { %185 = vmatprep.subr.mxu0 %v94_v45  ;;  %268 = vmatprep.subr.mxu1 %v96_v46  ;;  %v356_v5 = vld [vmem:[#allocation8 + $0x78] sm:$0xff]  ;;  %v403_v9 = vld [vmem:[#allocation8 + $0x1f0] sm:$0xff]  ;;  %v402_v14 = vld [vmem:[#allocation8 + $0x1e8] sm:$0xff] }
  0x4d   :  { %186 = vmatpush1.msra.mxu0 %v93_v47  ;;  %269 = vmatpush1.msra.mxu1 %v95_v48  ;;  %v388_v6 = vld [vmem:[#allocation8 + $0x178] sm:$0xff]  ;;  %v355_v10 = vld [vmem:[#allocation8 + $0x70] sm:$0xff]  ;;  %v354_v15 = vld [vmem:[#allocation8 + $0x68] sm:$0xff] }
  0x4e   :  { %187 = vmatprep.subr.mxu0 %v90_v49  ;;  %270 = vmatprep.subr.mxu1 %v92_v50  ;;  %v387_v11 = vld [vmem:[#allocation8 + $0x170] sm:$0xff]  ;;  %v386_v16 = vld [vmem:[#allocation8 + $0x168] sm:$0xff]  ;;  %v401_v18 = vld [vmem:[#allocation8 + $0x1e0] sm:$0xff] }
  0x4f   :  { %188 = vmatpush1.msra.mxu0 %v89_v51  ;;  %271 = vmatpush1.msra.mxu1 %v91_v52  ;;  %v76_v12 = vld [vmem:[#allocation2 + $0x10] sm:$0xff]  ;;  %v353_v19 = vld [vmem:[#allocation8 + $0x60] sm:$0xff]  ;;  %v366_v28 = vld [vmem:[#allocation8 + $0xc8] sm:$0xff] }
  0x50   :  { %189 = vmatprep.subr.mxu0 %v86_v53  ;;  %272 = vmatprep.subr.mxu1 %v88_v54  ;;  %v385_v20 = vld [vmem:[#allocation8 + $0x160] sm:$0xff]  ;;  %v400_v21 = vld [vmem:[#allocation8 + $0x1d8] sm:$0xff]  ;;  %v367_v24 = vld [vmem:[#allocation8 + $0xd0] sm:$0xff] }
  0x51   :  { %190 = vmatpush1.msra.mxu0 %v85_v55  ;;  %273 = vmatpush1.msra.mxu1 %v87_v56  ;;  %v352_v22 = vld [vmem:[#allocation8 + $0x58] sm:$0xff]  ;;  %v399_v25 = vld [vmem:[#allocation8 + $0x1d0] sm:$0xff]  ;;  %v398_v29 = vld [vmem:[#allocation8 + $0x1c8] sm:$0xff] }
  0x52   :  { %191 = vmatprep.subr.mxu0 %v82_v57  ;;  %274 = vmatprep.subr.mxu1 %v84_v58  ;;  %v384_v23 = vld [vmem:[#allocation8 + $0x158] sm:$0xff]  ;;  %v351_v26 = vld [vmem:[#allocation8 + $0x50] sm:$0xff]  ;;  %v350_v30 = vld [vmem:[#allocation8 + $0x48] sm:$0xff] }
  0x53   :  { %192 = vmatpush1.msra.mxu0 %v81_v59  ;;  %275 = vmatpush1.msra.mxu1 %v83_v60  ;;  %v383_v27 = vld [vmem:[#allocation8 + $0x150] sm:$0xff]  ;;  %v382_v31 = vld [vmem:[#allocation8 + $0x148] sm:$0xff]  ;;  %v365_v32 = vld [vmem:[#allocation8 + $0xc0] sm:$0xff] }
  0x54   :  { %193 = vmatprep.subr.mxu0 %v78_v61  ;;  %276 = vmatprep.subr.mxu1 %v80_v62  ;;  %v397_v33 = vld [vmem:[#allocation8 + $0x1c0] sm:$0xff]  ;;  %v364_v36 = vld [vmem:[#allocation8 + $0xb8] sm:$0xff]  ;;  %v363_v40 = vld [vmem:[#allocation8 + $0xb0] sm:$0xff] }
  0x55   :  { %194 = vmatpush1.msra.mxu0 %v77_v63  ;;  %277 = vmatpush1.msra.mxu1 %v79_v1  ;;  %v349_v34 = vld [vmem:[#allocation8 + $0x40] sm:$0xff]  ;;  %v396_v37 = vld [vmem:[#allocation8 + $0x1b8] sm:$0xff]  ;;  %v395_v41 = vld [vmem:[#allocation8 + $0x1b0] sm:$0xff] }
  0x56   :  { %228 = vmatmul.mubr.f32.vlgmr.msra.gmra.mxu0 %v74_v2  ;;  %311 = vmatmul.mubr.f32.vlgmr.msra.gmra.mxu1 %v74_v2  ;;  %v381_v35 = vld [vmem:[#allocation8 + $0x140] sm:$0xff]  ;;  %v348_v38 = vld [vmem:[#allocation8 + $0x38] sm:$0xff]  ;;  %v347_v42 = vld [vmem:[#allocation8 + $0x30] sm:$0xff] }
  0x57   :  { %233 = vmatprep.mubr.f32.mxu0 %v803_v0  ;;  %316 = vmatprep.mubr.f32.mxu1 %v803_v0  ;;  %v380_v39 = vld [vmem:[#allocation8 + $0x138] sm:$0xff]  ;;  %v379_v43 = vld [vmem:[#allocation8 + $0x130] sm:$0xff]  ;;  %v362_v44 = vld [vmem:[#allocation8 + $0xa8] sm:$0xff] }
  0x58   :  { %595 = vmatprep.subr.mxu0 %v372_v3  ;;  %636 = vmatprep.subr.mxu1 %v404_v4  ;;  %v394_v45 = vld [vmem:[#allocation8 + $0x1a8] sm:$0xff]  ;;  %v361_v48 = vld [vmem:[#allocation8 + $0xa0] sm:$0xff]  ;;  %v360_v52 = vld [vmem:[#allocation8 + $0x98] sm:$0xff] }
  0x59   :  { %596 = vmatpush3.msra.mxu0 %v356_v5  ;;  %637 = vmatpush3.msra.mxu1 %v388_v6  ;;  %v346_v46 = vld [vmem:[#allocation8 + $0x28] sm:$0xff]  ;;  %v393_v49 = vld [vmem:[#allocation8 + $0x1a0] sm:$0xff]  ;;  %v392_v53 = vld [vmem:[#allocation8 + $0x198] sm:$0xff]  ;;  %v143_v5 = vlaneseq }
  0x5a   :  { %234 = vmatmul.mubr.f32.gmra.mxu0 %v75_v7  ;;  %317 = vmatmul.mubr.f32.gmra.mxu1 %v75_v7  ;;  %v378_v47 = vld [vmem:[#allocation8 + $0x128] sm:$0xff]  ;;  %v345_v50 = vld [vmem:[#allocation8 + $0x20] sm:$0xff]  ;;  %v344_v54 = vld [vmem:[#allocation8 + $0x18] sm:$0xff] }
  0x5b   :  { %239 = vmatprep.mubr.f32.mxu0 %v803_v0  ;;  %322 = vmatprep.mubr.f32.mxu1 %v803_v0  ;;  %v368_v0 = vld [vmem:[#allocation8 + $0xd8] sm:$0xff]  ;;  %v377_v51 = vld [vmem:[#allocation8 + $0x120] sm:$0xff]  ;;  %v359_v56 = vld [vmem:[#allocation8 + $0x90] sm:$0xff]  ;;  %v144_v6 = vshrl.u32 %v143_v5, 7 }
  0x5c   :  { %597 = vmatprep.subr.mxu0 %v371_v8  ;;  %638 = vmatprep.subr.mxu1 %v403_v9  ;;  %v376_v55 = vld [vmem:[#allocation8 + $0x118] sm:$0xff]  ;;  %v391_v57 = vld [vmem:[#allocation8 + $0x190] sm:$0xff]  ;;  %v358_v60 = vld [vmem:[#allocation8 + $0x88] sm:$0xff] }
  0x5d   :  { %598 = vmatpush3.msra.mxu0 %v355_v10  ;;  %639 = vmatpush3.msra.mxu1 %v387_v11  ;;  %v343_v58 = vld [vmem:[#allocation8 + $0x10] sm:$0xff]  ;;  %v390_v61 = vld [vmem:[#allocation8 + $0x188] sm:$0xff]  ;;  %v357_v1 = vld [vmem:[#allocation8 + $0x80] sm:$0xff]  ;;  %v153_v7 = vsub.s32 2, %v144_v6  ;;  %v145_v8 = vsub.s32 0, %v144_v6  ;;  %v149_v10 = vsub.s32 1, %v144_v6 }
  0x5e   :  { %240 = vmatmul.mubr.f32.gmra.mxu0 %v76_v12  ;;  %323 = vmatmul.mubr.f32.gmra.mxu1 %v76_v12  ;;  %v375_v59 = vld [vmem:[#allocation8 + $0x110] sm:$0xff]  ;;  %v342_v62 = vld [vmem:[#allocation8 + $0x8] sm:$0xff]  ;;  %v389_v2 = vld [vmem:[#allocation8 + $0x180] sm:$0xff]  ;;  %v157_v11 = vsub.s32 3, %v144_v6 }
  0x5f   :  { %599 = vmatprep.subr.mxu0 %v370_v13  ;;  %640 = vmatprep.subr.mxu1 %v402_v14  ;;  %v374_v63 = vld [vmem:[#allocation8 + $0x108] sm:$0xff]  ;;  %v341_v3 = vld [vmem:[#allocation8] sm:$0xff]  ;;  %v141_v9 = vld [vmem:[#allocation7] sm:$0xf] }
  0x60   :  { %600 = vmatpush3.msra.mxu0 %v354_v15  ;;  %641 = vmatpush3.msra.mxu1 %v386_v16  ;;  %v373_v4 = vld [vmem:[#allocation8 + $0x100] sm:$0xff]  ;;  %v154_v12 = vrot.slane %v141_v9, %v153_v7  ;;  %v146_v13 = vrot.slane %v141_v9, %v145_v8  ;;  %v150_v14 = vrot.slane %v141_v9, %v149_v10 }
  0x61   :  { %601 = vmatprep.subr.mxu0 %v369_v17  ;;  %642 = vmatprep.subr.mxu1 %v401_v18  ;;  %v158_v15 = vrot.slane %v141_v9, %v157_v11 }
  0x62   :  { %602 = vmatpush3.msra.mxu0 %v353_v19  ;;  %643 = vmatpush3.msra.mxu1 %v385_v20 }
  0x63   :  { %603 = vmatprep.subr.mxu0 %v368_v0  ;;  %644 = vmatprep.subr.mxu1 %v400_v21 }
  0x64   :  { %604 = vmatpush3.msra.mxu0 %v352_v22  ;;  %645 = vmatpush3.msra.mxu1 %v384_v23 }
  0x65   :  { %605 = vmatprep.subr.mxu0 %v367_v24  ;;  %646 = vmatprep.subr.mxu1 %v399_v25 }
  0x66   :  { %606 = vmatpush3.msra.mxu0 %v351_v26  ;;  %647 = vmatpush3.msra.mxu1 %v383_v27 }
  0x67   :  { %607 = vmatprep.subr.mxu0 %v366_v28  ;;  %648 = vmatprep.subr.mxu1 %v398_v29 }
  0x68   :  { %608 = vmatpush3.msra.mxu0 %v350_v30  ;;  %649 = vmatpush3.msra.mxu1 %v382_v31 }
  0x69   :  { %609 = vmatprep.subr.mxu0 %v365_v32  ;;  %650 = vmatprep.subr.mxu1 %v397_v33 }
  0x6a   :  { %610 = vmatpush3.msra.mxu0 %v349_v34  ;;  %651 = vmatpush3.msra.mxu1 %v381_v35 }
  0x6b   :  { %611 = vmatprep.subr.mxu0 %v364_v36  ;;  %652 = vmatprep.subr.mxu1 %v396_v37 }
  0x6c   :  { %612 = vmatpush3.msra.mxu0 %v348_v38  ;;  %653 = vmatpush3.msra.mxu1 %v380_v39 }
  0x6d   :  { %613 = vmatprep.subr.mxu0 %v363_v40  ;;  %654 = vmatprep.subr.mxu1 %v395_v41 }
  0x6e   :  { %614 = vmatpush3.msra.mxu0 %v347_v42  ;;  %655 = vmatpush3.msra.mxu1 %v379_v43 }
  0x6f   :  { %615 = vmatprep.subr.mxu0 %v362_v44  ;;  %656 = vmatprep.subr.mxu1 %v394_v45 }
  0x70   :  { %616 = vmatpush3.msra.mxu0 %v346_v46  ;;  %657 = vmatpush3.msra.mxu1 %v378_v47 }
  0x71   :  { %617 = vmatprep.subr.mxu0 %v361_v48  ;;  %658 = vmatprep.subr.mxu1 %v393_v49 }
  0x72   :  { %618 = vmatpush3.msra.mxu0 %v345_v50  ;;  %659 = vmatpush3.msra.mxu1 %v377_v51 }
  0x73   :  { %619 = vmatprep.subr.mxu0 %v360_v52  ;;  %660 = vmatprep.subr.mxu1 %v392_v53  ;;  %v594_v53 = vld [vmem:[%s872_s4] ss:$0 sm:$0xff]  ;;  %s804_s4 = smov [#allocation10]  }
  0x74   :  { %620 = vmatpush3.msra.mxu0 %v344_v54  ;;  %661 = vmatpush3.msra.mxu1 %v376_v55  ;;  %s580_s15 = sshll.u32 %s804_s4, 4  ;;  %s581_s15 = int_to_ptr.vmem [resolvable:$true] %s580_s15 }
  0x75   :  { %621 = vmatprep.subr.mxu0 %v359_v56  ;;  %662 = vmatprep.subr.mxu1 %v391_v57  ;;  %s767_s16 = scalar_lea.vmem %s581_s15, 384  ;;  %p772_p7 = scmp.lt.s32.totalorder %s581_s15, %s581_s15 }
  0x76   :  { %622 = vmatpush3.msra.mxu0 %v343_v58  ;;  %663 = vmatpush3.msra.mxu1 %v375_v59  ;;  %p768_p6 = scmp.ne.s32.totalorder %s581_s15, %s767_s16  ;;  %p773_p8 = scmp.lt.s32.totalorder %s767_s16, %s767_s16 }
  0x77   :  { %623 = vmatprep.subr.mxu0 %v358_v60  ;;  %664 = vmatprep.subr.mxu1 %v390_v61 }
  0x78   :  { %624 = vmatpush3.msra.mxu0 %v342_v62  ;;  %665 = vmatpush3.msra.mxu1 %v374_v63  ;;  %p774_p9 = por %p773_p8, %p772_p7 }
  0x79   :  { %625 = vmatprep.subr.mxu0 %v357_v1  ;;  %666 = vmatprep.subr.mxu1 %v389_v2 }
  0x7a   :  { %626 = vmatpush3.msra.mxu0 %v341_v3  ;;  %667 = vmatpush3.msra.mxu1 %v373_v4  ;;  %p775_p10 = pnand %p774_p9, %p768_p6 }
 0x116   :  { %v229_v16 = vpop.f32.mrf.mxu0  ;;  %v312_v17 = vpop.f32.mrf.mxu1 }
 0x117   :  { %v313_v18 = vadd.f32 %v312_v17, %v154_v12  ;;  %v230_v19 = vadd.f32 %v229_v16, %v146_v13 }
 0x118   :  { %v231_v20 = vpop.f32.mrf.mxu0  ;;  %v314_v0 = vpop.f32.mrf.mxu1 }
 0x119   :  { %v232_v21 = vadd.f32 %v231_v20, %v150_v14  ;;  %v315_v22 = vadd.f32 %v314_v0, %v158_v15  ;;  %v331_v23 = vmax.f32 %v313_v18, 0.0  ;;  %v329_v29 = vmax.f32 %v230_v19, 0.0 }
 0x11a   :  { %v235_v24 = vpop.f32.mrf.mxu0  ;;  %v318_v25 = vpop.f32.mrf.mxu1 }
 0x11b   :  { %v330_v26 = vmax.f32 %v232_v21, 0.0  ;;  %v332_v27 = vmax.f32 %v315_v22, 0.0  ;;  %v319_v28 = vadd.f32 %v318_v25, %v154_v12  ;;  %v236_v30 = vadd.f32 %v235_v24, %v146_v13 }
 0x11c   :  { %v237_v31 = vpop.f32.mrf.mxu0  ;;  %v320_v32 = vpop.f32.mrf.mxu1 }
 0x11d   :  { %v238_v33 = vadd.f32 %v237_v31, %v150_v14  ;;  %v321_v34 = vadd.f32 %v320_v32, %v158_v15  ;;  %476 = vmatprep.mubr.f32.mxu0 %v330_v26  ;;  %556 = vmatprep.mubr.f32.mxu1 %v332_v27  ;;  %v335_v35 = vmax.f32 %v319_v28, 0.0  ;;  %v333_v41 = vmax.f32 %v236_v30, 0.0 }
 0x11e   :  { %v241_v36 = vpop.f32.mrf.mxu0  ;;  %v324_v37 = vpop.f32.mrf.mxu1  ;;  %477 = vmatmul.mubr.f32.vlgmr.msra.gmra.mxu0 %v329_v29  ;;  %557 = vmatmul.mubr.f32.vlgmr.msra.gmra.mxu1 %v331_v23 }
 0x11f   :  { %v334_v38 = vmax.f32 %v238_v33, 0.0  ;;  %v336_v39 = vmax.f32 %v321_v34, 0.0  ;;  %v325_v40 = vadd.f32 %v324_v37, %v154_v12  ;;  %v242_v42 = vadd.f32 %v241_v36, %v146_v13 }
 0x120   :  { %v243_v43 = vpop.f32.mrf.mxu0  ;;  %v326_v44 = vpop.f32.mrf.mxu1 }
 0x121   :  { %v244_v45 = vadd.f32 %v243_v43, %v150_v14  ;;  %v327_v46 = vadd.f32 %v326_v44, %v158_v15  ;;  %481 = vmatprep.mubr.f32.mxu0 %v334_v38  ;;  %561 = vmatprep.mubr.f32.mxu1 %v336_v39  ;;  %v339_v47 = vmax.f32 %v325_v40, 0.0  ;;  %v337_v50 = vmax.f32 %v242_v42, 0.0 }
 0x122   :  { %482 = vmatmul.mubr.f32.gmra.mxu0 %v333_v41  ;;  %562 = vmatmul.mubr.f32.gmra.mxu1 %v335_v35 }
 0x123   :  { %v338_v48 = vmax.f32 %v244_v45, 0.0  ;;  %v340_v49 = vmax.f32 %v327_v46, 0.0 }
 0x125   :  { %486 = vmatprep.mubr.f32.mxu0 %v338_v48  ;;  %566 = vmatprep.mubr.f32.mxu1 %v340_v49 }
 0x126   :  { %487 = vmatmul.mubr.f32.gmra.mxu0 %v337_v50  ;;  %567 = vmatmul.mubr.f32.gmra.mxu1 %v339_v47 }
 0x1de   :  { %v627_v51 = vpop.f32.mrf.mxu0  ;;  %v668_v52 = vpop.f32.mrf.mxu1 }
 0x1e0   :  { %v628_v54 = vpop.f32.mrf.mxu0  ;;  %v669_v55 = vpop.f32.mrf.mxu1 }
 0x1e1   :  { %v629_v56 = vadd.f32 %v628_v54, %v627_v51  ;;  %v670_v60 = vadd.f32 %v669_v55, %v668_v52 }
 0x1e2   :  { %v630_v57 = vpop.f32.mrf.mxu0  ;;  %v671_v58 = vpop.f32.mrf.mxu1 }
 0x1e3   :  { %v479_v59 = vadd.f32 %v629_v56, %v594_v53 }
 0x1e4   :  { %v631_v61 = vpop.f32.mrf.mxu0  ;;  %v672_v62 = vpop.f32.mrf.mxu1 }
 0x1e5   :  { %v559_v63 = vadd.f32 %v670_v60, %v479_v59  ;;  %v632_v1 = vadd.f32 %v631_v61, %v630_v57  ;;  %v673_v5 = vadd.f32 %v672_v62, %v671_v58 }
 0x1e6   :  { %v633_v2 = vpop.f32.mrf.mxu0  ;;  %v674_v3 = vpop.f32.mrf.mxu1 }
 0x1e7   :  { %572 = vst [vmem:[#allocation10] sm:$0xff] %v559_v63  ;;  %v484_v4 = vadd.f32 %v632_v1, %v594_v53 }
 0x1e8   :  { %v634_v6 = vpop.f32.mrf.mxu0  ;;  %v675_v7 = vpop.f32.mrf.mxu1 }
 0x1e9   :  { %v564_v8 = vadd.f32 %v673_v5, %v484_v4  ;;  %v635_v9 = vadd.f32 %v634_v6, %v633_v2  ;;  %v676_v11 = vadd.f32 %v675_v7, %v674_v3 }
 0x1eb   :  { %573 = vst [vmem:[#allocation10 + $0x8] sm:$0xff] %v564_v8  ;;  %v489_v10 = vadd.f32 %v635_v9, %v594_v53 }
 0x1ed   :  { %v569_v12 = vadd.f32 %v676_v11, %v489_v10 }
 0x1ef   :  { %574 = vst [vmem:[#allocation10 + $0x10] sm:$0xff] %v569_v12 }
 0x1f0   :  { %778 = shalt.err (!%p775_p10)
}
 0x1f1   :  { %586 = dma.vmem_to_hbm [thread:$0]  %s581_s15, 384, %s873_s5, [#allocation4], %s799_s28, %s799_s28, %s800_s29  }
 0x1f2   :  { %793 = dma.done.wait [#allocation4], 384  }
 0x1f3   :  { %794 = vsyncadd [#allocation4], 4294966912 }
 0x1f4   :  { %590 = vsyncpa [#allocation3], 1 }
 0x1f5   :  { %591 = vsyncpa [#allocation6], 1 }
 0x1f6   :  { %592 = vsyncpa [#allocation9], 1 }
 0x1f7   :  { %593 = vsyncpa [#allocation4], 1 }

</bundles_post_ra>
